<compile_context>
chip_gen: v5e
topology: v5e:2x2
jax: 0.10.0
libtpu: 0.0.40
codegen_flags: <defaults>
</compile_context>

<pallas_src>
import jax
import jax.numpy as jnp
from jax import lax
from jax.experimental import pallas as pl
from jax.experimental.pallas import tpu as pltpu

EPS = 1e-12  # F.normalize default eps


def _round_up(v, m):
    return (v + m - 1) // m * m


def _sublane_pack(dtype):
    # Sub-32-bit dtypes pack along sublanes: 8 rows (f32), 16 (bf16), 32 (i8).
    bits = jnp.dtype(dtype).itemsize * 8
    return max(8, (32 // bits) * 8)


def _choose_feature_tiles(k, m, w_dtype):
    """Lane-aligned K/M padding and an out-feature tile tn sized so a single
    (k_p, tn) weight slab stays ~<=12 MiB (fits v7x 64 MiB VMEM with headroom
    for double-buffered x / out tiles)."""
    w_bytes = jnp.dtype(w_dtype).itemsize
    k_p = _round_up(k, 128)
    budget = 12 * 1024 * 1024
    max_tn = max(128, (budget // (k_p * w_bytes)) // 128 * 128)
    tn = int(min(_round_up(m, 128), max_tn, 2048))
    m_p = _round_up(m, tn)
    return k_p, m_p, tn


def _choose_batch_tile(n, x_dtype, block_rows):
    pack = _sublane_pack(x_dtype)
    block_rows = _round_up(block_rows, 256)  # MXU-sized tiles when n is large
    tm = int(min(_round_up(n, pack), block_rows))
    n_p = _round_up(n, tm)
    return tm, n_p


def _normed_linear_kernel(x_ref, inv_row_ref, w_ref, inv_col_ref, o_ref):
    # Raw-operand matmul on the MXU (f32 accumulation), scale on the way out.
    acc = jnp.dot(x_ref[...], w_ref[...], preferred_element_type=jnp.float32)
    o_ref[...] = (acc * inv_row_ref[...] * inv_col_ref[...]).astype(o_ref.dtype)


def prepare_normed_linear_params(weight):
    """One-time weight preparation (hoist out of the per-call path).

    Pads the weight to lane-aligned (k_p, m_p) and precomputes the inverse
    column norms in f32.  Cache the result and pass it via `params=` to
    normed_linear so the forward pass never re-copies the weight in HBM.
    """
    k, m = weight.shape
    k_p, m_p, tn = _choose_feature_tiles(k, m, weight.dtype)
    w_p = jnp.pad(weight, ((0, k_p - k), (0, m_p - m)))
    wf = w_p.astype(jnp.float32)
    col_ss = jnp.sum(wf * wf, axis=0, keepdims=True)             # (1, m_p)
    inv_col = lax.rsqrt(jnp.maximum(col_ss, EPS * EPS))           # f32
    return {
        "w_p": w_p,
        "inv_col": inv_col,
        "tn": tn,
        "in_features": k,
        "out_features": m,
    }


def normed_linear(x, weight=None, *, params=None, block_rows=256):
    """out = F.normalize(x, dim=1) @ F.normalize(weight, dim=0)."""
    if params is None:
        params = prepare_normed_linear_params(weight)
    w_p = params["w_p"]
    inv_col = params["inv_col"]
    tn = params["tn"]
    m = params["out_features"]
    k = params["in_features"]

    n, kx = x.shape
    assert kx == k, (kx, k)
    k_p, m_p = w_p.shape
    out_dtype = x.dtype

    tm, n_p = _choose_batch_tile(n, x.dtype, block_rows)

    # Pad x (zero rows/cols are exact: they contribute zero products and the
    # padded outputs are sliced off) and precompute row inverse-norms in f32
    # (fuses with the pad in one XLA pass).
    x_p = jnp.pad(x, ((0, n_p - n), (0, k_p - k)))
    xf = x_p.astype(jnp.float32)
    row_ss = jnp.sum(xf * xf, axis=1, keepdims=True)              # (n_p, 1)
    inv_row = lax.rsqrt(jnp.maximum(row_ss, EPS * EPS))           # f32

    in_bytes = jnp.dtype(x.dtype).itemsize
    w_bytes = jnp.dtype(w_p.dtype).itemsize
    out_bytes = jnp.dtype(out_dtype).itemsize

    # VMEM budget: weight slab (counted twice for headroom even though it is
    # single-buffered), double-buffered x / out tiles, scale vectors, slack.
    vmem_budget = (
        2 * k_p * tn * w_bytes
        + 2 * tm * k_p * in_bytes
        + 2 * tm * tn * out_bytes
        + 2 * (tm + tn) * 4
        + (4 << 20)
    )
    vmem_limit = int(min(max(vmem_budget, 16 << 20), 64 << 20))

    cost = pl.CostEstimate(
        flops=2 * n_p * k_p * m_p,
        transcendentals=0,
        bytes_accessed=(
            n_p * k_p * in_bytes
            + k_p * m_p * w_bytes
            + n_p * m_p * out_bytes
            + (n_p + m_p) * 4
        ),
    )

    grid = (m_p // tn, n_p // tm)  # weight axis outer (slow), batch inner

    out = pl.pallas_call(
        _normed_linear_kernel,
        out_shape=jax.ShapeDtypeStruct((n_p, m_p), out_dtype),
        grid_spec=pltpu.PrefetchScalarGridSpec(
            num_scalar_prefetch=0,
            grid=grid,
            in_specs=[
                # x tile and row scales march over the batch (inner axis).
                pl.BlockSpec((tm, k_p), lambda j, i: (i, 0)),
                pl.BlockSpec((tm, 1), lambda j, i: (i, 0)),
                # Weight slab changes only on the outer axis -> DMA'd once per
                # out-tile and reused for every batch tile; single-buffered.
                pl.BlockSpec((k_p, tn), lambda j, i: (0, j),
                             pipeline_mode=pl.Buffered(1)),
                pl.BlockSpec((1, tn), lambda j, i: (0, j)),
            ],
            out_specs=pl.BlockSpec((tm, tn), lambda j, i: (i, j)),
        ),
        compiler_params=pltpu.CompilerParams(
            dimension_semantics=("parallel", "parallel"),
            vmem_limit_bytes=vmem_limit,
        ),
        cost_estimate=cost,
    )(x_p, inv_row, w_p, inv_col)
    return out[:n, :m]


def init_normed_linear_weight(key, in_features, out_features):
    # PyTorch init: uniform_(-1, 1).renorm_(2, 1, 1e-5).mul_(1e5)
    # -> columns rescaled to (at most) unit L2 norm; forward re-normalizes.
    w = jax.random.uniform(
        key, (in_features, out_features), minval=-1.0, maxval=1.0,
        dtype=jnp.float32,
    )
    col_norm = jnp.sqrt(jnp.sum(w * w, axis=0, keepdims=True))
    scale = jnp.minimum(1.0, 1e-5 / jnp.maximum(col_norm, 1e-12))
    return w * scale * 1e5


def reference_normed_linear(x, weight):
    xn = x / jnp.maximum(jnp.linalg.norm(x, axis=1, keepdims=True), EPS)
    wn = weight / jnp.maximum(jnp.linalg.norm(weight, axis=0, keepdims=True), EPS)
    return xn @ wn


if __name__ == "__main__":
    key = jax.random.PRNGKey(0)
    kx, kw = jax.random.split(key)

    batch, in_features, out_features = 8, 32, 16
    x = jax.random.normal(kx, (batch, in_features), dtype=jnp.float32)
    weight = init_normed_linear_weight(kw, in_features, out_features)

    # Weight padding + column-norm precompute hoisted out of the call path.
    params = prepare_normed_linear_params(weight)
    out = normed_linear(x, params=params)
    out = jax.block_until_ready(out)

    ref = reference_normed_linear(x, weight)
    assert out.shape == (batch, out_features)
    assert jnp.allclose(out, ref, atol=1e-5, rtol=1e-5)

    print("KERNEL_OK")
</pallas_src>

<mosaic_0001>
module attributes {stable_mosaic.version = 11 : i64} {
  func.func @_normed_linear_kernel(%arg0: i32, %arg1: i32, %arg2: memref<8x128xf32, #tpu.memory_space<vmem>>, %arg3: memref<8x1xf32, #tpu.memory_space<vmem>>, %arg4: memref<128x128xf32, #tpu.memory_space<vmem>>, %arg5: memref<1x128xf32, #tpu.memory_space<vmem>>, %arg6: memref<8x128xf32, #tpu.memory_space<vmem>>) attributes {dimension_semantics = [#tpu.dimension_semantics<parallel>, #tpu.dimension_semantics<parallel>], iteration_bounds = array<i64: 1, 1>, scalar_prefetch = 0 : i64, scratch_operands = 0 : i64, tpu.core_type = #tpu.core_type<tc>, window_params = [{transform_indices = @transform_0, window_bounds = array<i64: 8, 128>}, {transform_indices = @transform_1, window_bounds = array<i64: 8, 1>}, {pipeline_mode = #tpu.pipeline_mode<synchronous>, transform_indices = @transform_2, window_bounds = array<i64: 128, 128>}, {transform_indices = @transform_3, window_bounds = array<i64: 1, 128>}, {transform_indices = @transform_4, window_bounds = array<i64: 8, 128>}]} {
    %c0 = arith.constant 0 : index
    %c0_0 = arith.constant 0 : index
    %0 = vector.load %arg2[%c0, %c0_0] : memref<8x128xf32, #tpu.memory_space<vmem>>, vector<8x128xf32>
    %c0_1 = arith.constant 0 : index
    %c0_2 = arith.constant 0 : index
    %1 = vector.load %arg4[%c0_1, %c0_2] : memref<128x128xf32, #tpu.memory_space<vmem>>, vector<128x128xf32>
    %cst = arith.constant dense<0.000000e+00> : vector<8x128xf32>
    %2 = tpu.matmul %0, %1, %cst {dimension_numbers = #tpu.dot_dimension_numbers<[1], [0], [0], [1], [0, 0, 1, 1], [], []>} : vector<8x128xf32>, vector<128x128xf32>, vector<8x128xf32> -> vector<8x128xf32>
    %c0_3 = arith.constant 0 : index
    %c0_4 = arith.constant 0 : index
    %3 = vector.load %arg3[%c0_3, %c0_4] : memref<8x1xf32, #tpu.memory_space<vmem>>, vector<8x1xf32>
    %4 = vector.broadcast %3 : vector<8x1xf32> to vector<8x128xf32>
    %5 = arith.mulf %2, %4 : vector<8x128xf32>
    %c0_5 = arith.constant 0 : index
    %c0_6 = arith.constant 0 : index
    %6 = vector.load %arg5[%c0_5, %c0_6] : memref<1x128xf32, #tpu.memory_space<vmem>>, vector<1x128xf32>
    %7 = vector.broadcast %6 : vector<1x128xf32> to vector<8x128xf32>
    %8 = arith.mulf %5, %7 : vector<8x128xf32>
    %c0_7 = arith.constant 0 : index
    %c0_8 = arith.constant 0 : index
    %9 = vector.load %arg6[%c0_7, %c0_8] : memref<8x128xf32, #tpu.memory_space<vmem>>, vector<8x128xf32>
    tpu.vector_store %arg6[%c0_7, %c0_8], %8 {strides = array<i32>} : memref<8x128xf32, #tpu.memory_space<vmem>>, vector<8x128xf32>,
    return
  }
  func.func @transform_0(%arg0: i32, %arg1: i32) -> (i32, i32) {
    %c0_i32 = arith.constant 0 : i32
    %c0_i32_0 = arith.constant 0 : i32
    return %arg1, %c0_i32 : i32, i32
  }
  func.func @transform_1(%arg0: i32, %arg1: i32) -> (i32, i32) {
    %c0_i32 = arith.constant 0 : i32
    %c0_i32_0 = arith.constant 0 : i32
    return %arg1, %c0_i32 : i32, i32
  }
  func.func @transform_2(%arg0: i32, %arg1: i32) -> (i32, i32) {
    %c0_i32 = arith.constant 0 : i32
    %c0_i32_0 = arith.constant 0 : i32
    return %c0_i32, %arg0 : i32, i32
  }
  func.func @transform_3(%arg0: i32, %arg1: i32) -> (i32, i32) {
    %c0_i32 = arith.constant 0 : i32
    %c0_i32_0 = arith.constant 0 : i32
    return %c0_i32, %arg0 : i32, i32
  }
  func.func @transform_4(%arg0: i32, %arg1: i32) -> (i32, i32) {
    %c0_i32 = arith.constant 0 : i32
    return %arg1, %arg0 : i32, i32
  }
}

</mosaic_0001>

<bundles_post_ra>
// kernel: tpu_custom_call.1
= control target key start
LH: loop header
LB: loop body
LE: loop exit
PB: predicated region body
PF: predicated region fallthrough
CT: control target
= control target key end

     0   :  { %9 = vsyncpa [#allocation3], 0  ;;  %s205_s0 = inlined_call_operand.vmem [shape: f32[8,128], index: 0, kind: input, shape index: {}]   ;;  %s206_s1 = inlined_call_operand.vmem [shape: f32[8,1], index: 1, kind: input, shape index: {}]   ;;  %s207_s2 = inlined_call_operand.hbm [shape: f32[128,128], index: 2, kind: input, shape index: {}]   ;;  %s208_s3 = inlined_call_operand.vmem [shape: f32[1,128], index: 3, kind: input, shape index: {}]   ;;  %s209_s4 = inlined_call_operand.hbm [shape: f32[8,128], index: 4, kind: output, shape index: {}]  }
   0x1   :  { %10 = vsyncpa [#allocation4], 0  ;;  %s19_s17 = sshll.u32 %s207_s2, 4  ;;  %s160_s18 = smov [#allocation2]   ;;  %s20_s17 = int_to_ptr.hbm [resolvable:$true] %s19_s17 }
   0x2   :  { %s21_s19 = sshll.u32 %s160_s18, 4  ;;  %s161_s20 = smov 128   ;;  %s22_s19 = int_to_ptr.vmem [resolvable:$true] %s21_s19 }
   0x3   :  { %s162_s21 = smov 8  }
   0x4   :  { %27 = dma.hbm_to_vmem [thread:$0]  %s20_s17, 2048, %s22_s19, [#allocation3], %s161_s20, %s161_s20, %s162_s21  }
   0x5   :  { %156 = dma.done.wait [#allocation3], 2048  }
   0x6   :  { %157 = vsyncadd [#allocation3], 4294965248  ;;  %v50_v0 = vld [vmem:[#allocation2 + $0x78] sm:$0xff]  ;;  %v49_v1 = vld [vmem:[#allocation2 + $0x70] sm:$0xff]  ;;  %v163_v2 = vmov 0   ;;  %s164_s26 = smov [#allocation5]  }
   0x7   :  { %51 = vmatpush.msra.mxu0 %v50_v0  ;;  %106 = vset.pattern.permute.xlu0 %v163_v2  ;;  %v48_v3 = vld [vmem:[#allocation2 + $0x68] sm:$0xff]  ;;  %v47_v4 = vld [vmem:[#allocation2 + $0x60] sm:$0xff]  ;;  %v46_v6 = vld [vmem:[#allocation2 + $0x58] sm:$0xff]  ;;  %s89_s27 = sshll.u32 %s164_s26, 4  ;;  %s91_s30 = sshll.u32 %s209_s4, 4  ;;  %s90_s27 = int_to_ptr.vmem [resolvable:$true] %s89_s27  ;;  %s92_s30 = int_to_ptr.hbm [resolvable:$true] %s91_s30 }
   0x8   :  { %v71_v5 = vld [vmem:[%s206_s1] sm:$0xff]  ;;  %v45_v7 = vld [vmem:[#allocation2 + $0x50] sm:$0xff]  ;;  %v44_v8 = vld [vmem:[#allocation2 + $0x48] sm:$0xff] }
   0x9   :  { %52 = vmatpush.msra.mxu0 %v49_v1  ;;  %74 = vperm.xlu0 %106, %v71_v5   ;;  %v43_v9 = vld [vmem:[#allocation2 + $0x40] sm:$0xff]  ;;  %v42_v10 = vld [vmem:[#allocation2 + $0x38] sm:$0xff]  ;;  %v41_v11 = vld [vmem:[#allocation2 + $0x30] sm:$0xff] }
   0xa   :  { %v40_v12 = vld [vmem:[#allocation2 + $0x28] sm:$0xff]  ;;  %v39_v13 = vld [vmem:[#allocation2 + $0x20] sm:$0xff]  ;;  %v38_v14 = vld [vmem:[#allocation2 + $0x18] sm:$0xff] }
   0xb   :  { %53 = vmatpush.msra.mxu0 %v48_v3  ;;  %v37_v15 = vld [vmem:[#allocation2 + $0x10] sm:$0xff]  ;;  %v36_v16 = vld [vmem:[#allocation2 + $0x8] sm:$0xff]  ;;  %v35_v17 = vld [vmem:[#allocation2] sm:$0xff] }
   0xc   :  { %v34_v18 = vld [vmem:[%s205_s0] sm:$0xff] }
   0xd   :  { %54 = vmatpush.msra.mxu0 %v47_v4  ;;  %v107_v20 = vld [vmem:[%s208_s3] ss:$0 sm:$0xff] }
   0xf   :  { %55 = vmatpush.msra.mxu0 %v46_v6 }
  0x11   :  { %56 = vmatpush.msra.mxu0 %v45_v7 }
  0x13   :  { %57 = vmatpush.msra.mxu0 %v44_v8 }
  0x15   :  { %58 = vmatpush.msra.mxu0 %v43_v9 }
  0x17   :  { %59 = vmatpush.msra.mxu0 %v42_v10 }
  0x19   :  { %60 = vmatpush.msra.mxu0 %v41_v11 }
  0x1b   :  { %61 = vmatpush.msra.mxu0 %v40_v12 }
  0x1d   :  { %62 = vmatpush.msra.mxu0 %v39_v13 }
  0x1f   :  { %63 = vmatpush.msra.mxu0 %v38_v14 }
  0x21   :  { %64 = vmatpush.msra.mxu0 %v37_v15 }
  0x23   :  { %65 = vmatpush.msra.mxu0 %v36_v16 }
  0x25   :  { %66 = vmatpush.msra.mxu0 %v35_v17 }
  0x26   :  { %67 = vmatmul.f32.vlgmr.msra.gmra.mxu0 %v34_v18 }
  0x7b   :  { %v75_v19 = vpop.permute.xlu0 %74 }
  0xa3   :  { %v68_v21 = vpop.f32.mrf.mxu0 }
  0xa4   :  { %v77_v22 = vmul.f32 %v75_v19, %v68_v21 }
  0xa6   :  { %v82_v23 = vmul.f32 %v107_v20, %v77_v22 }
  0xa8   :  { %83 = vst [vmem:[#allocation5] sm:$0xff] %v82_v23 }
  0xa9   :  { %94 = dma.vmem_to_hbm [thread:$0]  %s90_s27, 128, %s92_s30, [#allocation4]  }
  0xaa   :  { %158 = dma.done.wait [#allocation4], 128  }
  0xab   :  { %159 = vsyncadd [#allocation4], 4294967168 }
  0xac   :  { %99 = vsyncpa [#allocation3], 1 }
  0xad   :  { %100 = vsyncpa [#allocation4], 1 }

</bundles_post_ra>
